<compile_context>
chip_gen: v5e
topology: v5e:2x2
jax: 0.10.0
libtpu: 0.0.40
codegen_flags: <defaults>
</compile_context>

<pallas_src>
import functools

import jax
import jax.numpy as jnp
from jax import lax
from jax.experimental import pallas as pl
from jax.experimental.pallas import tpu as pltpu


# Stored as the "positive" for the self-view pair (w == i): makes
# logsumexp([pos, negatives]) - pos == 0 exactly, so that pair contributes nothing.
_POS_SENTINEL = 1e30


def _contrastive_loss_kernel(x_ref, o_ref, m_sc, l_sc, pos_sc, *, view_num, batch_size):
    i = pl.program_id(0)          # row view    ("parallel")
    w = pl.program_id(1)          # column view ("arbitrary" reduction axis)
    B = batch_size

    @pl.when(w == 0)
    def _init():
        m_sc[...] = jnp.full_like(m_sc, -jnp.inf)
        l_sc[...] = jnp.zeros_like(l_sc)

    # Views were L2-normalized and scaled by sqrt(1/temperature) in the wrapper, so
    # <x[i, b], x[w, c]> == cos(b, c) / temperature.  bf16 operands, f32 accumulation.
    xi = x_ref[i]                 # [B, D] bf16
    xw = x_ref[w]                 # [B, D] bf16

    sim = lax.dot_general(        # [B, B] f32, A.B^T straight on the MXU (no transpose)
        xi, xw,
        dimension_numbers=(((1,), (1,)), ((), ())),
        preferred_element_type=jnp.float32)

    # Positive logit of the (i, w) block = its diagonal, computed as a row-wise dot
    # (same bf16 products the MXU used; only the accumulation order differs).
    pos_w = jnp.sum(xi.astype(jnp.float32) * xw.astype(jnp.float32),
                    axis=-1, keepdims=True)                            # [B, 1] f32

    # Online log-sum-exp over this block's negatives: use the UNMASKED row max as the
    # shift (still a valid stabilizer) and remove the diagonal by subtracting its exp —
    # no [B, B] mask materialization or where passes.  exp is done in bf16 on the EUP;
    # all state / accumulation stays f32.
    m_new = jnp.maximum(m_sc[...], jnp.max(sim, axis=-1, keepdims=True))    # [B, 1]
    alpha = jnp.exp(m_sc[...] - m_new)                                      # 0 on 1st blk
    p = jnp.exp((sim - m_new).astype(jnp.bfloat16)).astype(jnp.float32)     # [B, B], <= 1
    blk_sum = jnp.sum(p, axis=-1, keepdims=True) - jnp.exp(pos_w - m_new)   # drop diagonal
    blk_sum = jnp.maximum(blk_sum, 0.0)                                     # B == 1 safety
    l_sc[...] = alpha * l_sc[...] + blk_sum
    m_sc[...] = m_new

    # Positive per column view; the self-view pair (w == i) gets a sentinel so its
    # cross-entropy term is exactly zero.
    pos_sc[w] = jnp.where(w == i, _POS_SENTINEL, pos_w)

    # Epilogue: cross entropy (label 0) over logits = [pos, negatives...] for each pair.
    @pl.when(w == view_num - 1)
    def _finalize():
        m = m_sc[...]             # [B, 1]   running max over all columns
        l = l_sc[...]             # [B, 1]   sum exp(neg - m), block diagonals excluded
        pos = pos_sc[...]         # [V, B, 1]
        big = jnp.maximum(m[None], pos)
        lse = big + jnp.log(jnp.exp(pos - big) + jnp.exp(m[None] - big) * l[None])
        per_pair = lse - pos                                    # 0 where w == i (sentinel)
        partial = jnp.sum(per_pair) * (1.0 / B)
        o_ref[...] = jnp.full(o_ref.shape, partial, jnp.float32)


def _round_up(v, m):
    return (v + m - 1) // m * m


def contrastive_loss(inputs, *, temperature, eps=1e-8):
    """inputs: list (len view_num) of [batch_size, D] arrays. Returns the scalar loss."""
    view_num = len(inputs)
    batch_size, feat_dim = inputs[0].shape

    # One-shot normalization pass: L2-normalize every view exactly once, fold
    # sqrt(1/temperature) into both operands (so the block matmul directly yields
    # cos / temperature) and cast to bf16 for the MXU.  Inputs stay in their native
    # dtype up to this fused pass; only the bf16 normalized tensor enters the kernel.
    # (eps clamps each norm at eps instead of the product of norms like
    # torch.CosineSimilarity; identical for non-degenerate inputs.)
    x = jnp.stack([jnp.asarray(v) for v in inputs], axis=0)             # [V, B, D]
    xf = x.astype(jnp.float32)
    inv_n = lax.rsqrt(jnp.maximum(jnp.sum(xf * xf, axis=-1, keepdims=True),
                                  float(eps) * float(eps)))
    scale = float(1.0 / temperature) ** 0.5
    x_hat = (xf * (inv_n * scale)).astype(jnp.bfloat16)                 # [V, B, D] bf16

    kernel = functools.partial(
        _contrastive_loss_kernel, view_num=view_num, batch_size=batch_size)

    # VMEM budget from the actual buffers, capped at 75% of the physical per-core VMEM
    # (64 MiB on v7x, 128 MiB on v5e/v6e).
    x_resident = view_num * _round_up(batch_size, 16) * _round_up(feat_dim, 128) * 2
    sim_block = _round_up(batch_size, 8) * _round_up(batch_size, 128) * 4
    scratch_bytes = (2 + view_num) * _round_up(batch_size, 8) * 128 * 4
    out_block = 8 * 128 * 4
    vmem_needed = (x_resident + 2 * out_block + scratch_bytes
                   + 4 * sim_block            # [B, B] sim / exp temporaries
                   + (2 << 20))               # headroom
    try:
        vmem_phys = int(pltpu.get_tpu_info().vmem_capacity_bytes)
    except Exception:
        vmem_phys = 64 << 20
    vmem_limit = int(min(max(vmem_needed, 4 << 20), (vmem_phys * 3) // 4))

    N = view_num * batch_size
    cost = pl.CostEstimate(
        flops=2 * N * N * feat_dim + 10 * N * N,
        transcendentals=N * N + 8 * N * view_num,
        bytes_accessed=view_num * batch_size * feat_dim * 2 + view_num * out_block)

    out = pl.pallas_call(
        kernel,
        out_shape=jax.ShapeDtypeStruct((view_num, 8, 128), jnp.float32),
        grid_spec=pltpu.PrefetchScalarGridSpec(
            num_scalar_prefetch=0,
            grid=(view_num, view_num),
            in_specs=[
                # Normalized views passed once, whole-array resident in VMEM; the kernel
                # indexes x_ref[i] / x_ref[w] directly (no duplicate double-buffered
                # input streams, HBM traffic = V*B*D bf16).
                pl.BlockSpec(memory_space=pltpu.MemorySpace.VMEM),
            ],
            out_specs=pl.BlockSpec((1, 8, 128), lambda i, w: (i, 0, 0)),
            scratch_shapes=[
                pltpu.VMEM((batch_size, 1), jnp.float32),            # running neg max
                pltpu.VMEM((batch_size, 1), jnp.float32),            # running neg sum-exp
                pltpu.VMEM((view_num, batch_size, 1), jnp.float32),  # positives per view
            ],
        ),
        compiler_params=pltpu.CompilerParams(
            dimension_semantics=("parallel", "arbitrary"),
            vmem_limit_bytes=vmem_limit,
        ),
        cost_estimate=cost,
    )(x_hat)

    return jnp.sum(out[:, 0, 0])


def _reference_loss(inputs, *, temperature, eps=1e-8):
    """Pure-JAX mirror of the PyTorch forward (float32) for verification."""
    view_num = len(inputs)
    batch_size = inputs[0].shape[0]
    x = jnp.concatenate([jnp.asarray(v, jnp.float32) for v in inputs], axis=0)
    N = view_num * batch_size
    norm = jnp.sqrt(jnp.sum(x * x, axis=-1, keepdims=True))
    sim = (x @ x.T) / jnp.maximum(norm * norm.T, eps) / temperature
    idx = jnp.arange(N)
    same = (idx[:, None] % batch_size) == (idx[None, :] % batch_size)
    neg = jnp.where(same, -jnp.inf, sim)                     # [N, N], same static shape
    total = 0.0
    for i in range(view_num):
        rows = slice(i * batch_size, (i + 1) * batch_size)
        neg_i = neg[rows]                                    # [B, N]
        for j in range(view_num):
            if j == i:
                continue
            cols = slice(j * batch_size, (j + 1) * batch_size)
            pos = jnp.diagonal(sim[rows, cols])[:, None]     # [B, 1]
            logits = jnp.concatenate([pos, neg_i], axis=1)
            lse = jax.scipy.special.logsumexp(logits, axis=1)
            total = total + jnp.sum(lse - pos[:, 0]) / batch_size
    return total


if __name__ == "__main__":
    view_num = 2
    batch_size = 4
    feat_dim = 32
    temperature = 0.5

    key = jax.random.PRNGKey(0)
    keys = jax.random.split(key, view_num)
    inputs = [jax.random.normal(k, (batch_size, feat_dim), jnp.float32) for k in keys]

    loss = contrastive_loss(inputs, temperature=temperature)
    jax.block_until_ready(loss)

    ref = _reference_loss(inputs, temperature=temperature)
    # bf16 MXU operands / bf16 EUP exp (f32 accumulation) => slightly looser tolerance
    # than the pure-f32 torch reference.
    assert jnp.allclose(loss, ref, rtol=2e-2, atol=5e-2), (loss, ref)

    print("KERNEL_OK")
</pallas_src>

<mosaic_0001>
module attributes {stable_mosaic.version = 11 : i64} {
  func.func @_contrastive_loss_kernel(%arg0: i32, %arg1: i32, %arg2: memref<2x4x32xbf16, #tpu.memory_space<vmem>>, %arg3: memref<1x8x128xf32, #tpu.memory_space<vmem>>, %arg4: memref<4x1xf32, #tpu.memory_space<vmem>>, %arg5: memref<4x1xf32, #tpu.memory_space<vmem>>, %arg6: memref<2x4x1xf32, #tpu.memory_space<vmem>>) attributes {dimension_semantics = [#tpu.dimension_semantics<parallel>, #tpu.dimension_semantics<arbitrary>], iteration_bounds = array<i64: 2, 2>, scalar_prefetch = 0 : i64, scratch_operands = 3 : i64, tpu.core_type = #tpu.core_type<tc>, window_params = [{pipeline_mode = #tpu.pipeline_mode<synchronous>, transform_indices = @transform_0, window_bounds = array<i64: 2, 4, 32>}, {transform_indices = @transform_1, window_bounds = array<i64: 1, 8, 128>}]} {
    %c0_i32 = arith.constant 0 : i32
    %0 = arith.cmpi eq, %arg1, %c0_i32 : i32
    %1 = arith.extui %0 : i1 to i32
    %c0_i32_0 = arith.constant 0 : i32
    %2 = arith.cmpi ne, %1, %c0_i32_0 : i32
    scf.if %2 {
      %cst_22 = arith.constant 0xFF800000 : f32
      %49 = vector.broadcast %cst_22 : f32 to vector<4x1xf32>
      %c0_23 = arith.constant 0 : index
      %c0_24 = arith.constant 0 : index
      %50 = vector.load %arg4[%c0_23, %c0_24] : memref<4x1xf32, #tpu.memory_space<vmem>>, vector<4x1xf32>
      tpu.vector_store %arg4[%c0_23, %c0_24], %49 {strides = array<i32>} : memref<4x1xf32, #tpu.memory_space<vmem>>, vector<4x1xf32>,
      %cst_25 = arith.constant 0.000000e+00 : f32
      %51 = vector.broadcast %cst_25 : f32 to vector<4x1xf32>
      %c0_26 = arith.constant 0 : index
      %c0_27 = arith.constant 0 : index
      %52 = vector.load %arg5[%c0_26, %c0_27] : memref<4x1xf32, #tpu.memory_space<vmem>>, vector<4x1xf32>
      tpu.vector_store %arg5[%c0_26, %c0_27], %51 {strides = array<i32>} : memref<4x1xf32, #tpu.memory_space<vmem>>, vector<4x1xf32>,
    } else {
    }
    %3 = arith.index_cast %arg0 : i32 to index
    %c0 = arith.constant 0 : index
    %c0_1 = arith.constant 0 : index
    %4 = vector.load %arg2[%3, %c0, %c0_1] : memref<2x4x32xbf16, #tpu.memory_space<vmem>>, vector<1x4x32xbf16>
    %5 = vector.shape_cast %4 : vector<1x4x32xbf16> to vector<4x32xbf16>
    %6 = arith.index_cast %arg1 : i32 to index
    %c0_2 = arith.constant 0 : index
    %c0_3 = arith.constant 0 : index
    %7 = vector.load %arg2[%6, %c0_2, %c0_3] : memref<2x4x32xbf16, #tpu.memory_space<vmem>>, vector<1x4x32xbf16>
    %8 = vector.shape_cast %7 : vector<1x4x32xbf16> to vector<4x32xbf16>
    %cst = arith.constant dense<0.000000e+00> : vector<4x4xf32>
    %9 = tpu.matmul %5, %8, %cst {dimension_numbers = #tpu.dot_dimension_numbers<[1], [1], [0], [0], [0, 0, 1, 0], [], []>} : vector<4x32xbf16>, vector<4x32xbf16>, vector<4x4xf32> -> vector<4x4xf32>
    %10 = arith.extf %5 : vector<4x32xbf16> to vector<4x32xf32>
    %11 = arith.extf %8 : vector<4x32xbf16> to vector<4x32xf32>
    %12 = arith.mulf %10, %11 : vector<4x32xf32>
    %cst_4 = arith.constant dense<0.000000e+00> : vector<4xf32>
    %13 = vector.multi_reduction <add>, %12, %cst_4 [1] : vector<4x32xf32> to vector<4xf32>
    %14 = vector.shape_cast %13 : vector<4xf32> to vector<4x1xf32>
    %c0_5 = arith.constant 0 : index
    %c0_6 = arith.constant 0 : index
    %15 = vector.load %arg4[%c0_5, %c0_6] : memref<4x1xf32, #tpu.memory_space<vmem>>, vector<4x1xf32>
    %cst_7 = arith.constant dense<0xFF800000> : vector<4xf32>
    %16 = vector.multi_reduction <maximumf>, %9, %cst_7 [1] : vector<4x4xf32> to vector<4xf32>
    %17 = vector.shape_cast %16 : vector<4xf32> to vector<4x1xf32>
    %18 = arith.maximumf %15, %17 : vector<4x1xf32>
    %c0_8 = arith.constant 0 : index
    %c0_9 = arith.constant 0 : index
    %19 = vector.load %arg4[%c0_8, %c0_9] : memref<4x1xf32, #tpu.memory_space<vmem>>, vector<4x1xf32>
    %20 = arith.subf %19, %18 : vector<4x1xf32>
    %21 = math.exp %20 : vector<4x1xf32>
    %22 = vector.broadcast %18 : vector<4x1xf32> to vector<4x4xf32>
    %23 = arith.subf %9, %22 : vector<4x4xf32>
    %24 = arith.truncf %23 : vector<4x4xf32> to vector<4x4xbf16>
    %25 = math.exp %24 : vector<4x4xbf16>
    %26 = arith.extf %25 : vector<4x4xbf16> to vector<4x4xf32>
    %cst_10 = arith.constant dense<0.000000e+00> : vector<4xf32>
    %27 = vector.multi_reduction <add>, %26, %cst_10 [1] : vector<4x4xf32> to vector<4xf32>
    %28 = vector.shape_cast %27 : vector<4xf32> to vector<4x1xf32>
    %29 = arith.subf %14, %18 : vector<4x1xf32>
    %30 = math.exp %29 : vector<4x1xf32>
    %31 = arith.subf %28, %30 : vector<4x1xf32>
    %cst_11 = arith.constant 0.000000e+00 : f32
    %32 = vector.broadcast %cst_11 : f32 to vector<4x1xf32>
    %33 = arith.maximumf %31, %32 : vector<4x1xf32>
    %c0_12 = arith.constant 0 : index
    %c0_13 = arith.constant 0 : index
    %34 = vector.load %arg5[%c0_12, %c0_13] : memref<4x1xf32, #tpu.memory_space<vmem>>, vector<4x1xf32>
    %35 = arith.mulf %21, %34 : vector<4x1xf32>
    %36 = arith.addf %35, %33 : vector<4x1xf32>
    %c0_14 = arith.constant 0 : index
    %c0_15 = arith.constant 0 : index
    %37 = vector.load %arg5[%c0_14, %c0_15] : memref<4x1xf32, #tpu.memory_space<vmem>>, vector<4x1xf32>
    tpu.vector_store %arg5[%c0_14, %c0_15], %36 {strides = array<i32>} : memref<4x1xf32, #tpu.memory_space<vmem>>, vector<4x1xf32>,
    %c0_16 = arith.constant 0 : index
    %c0_17 = arith.constant 0 : index
    %38 = vector.load %arg4[%c0_16, %c0_17] : memref<4x1xf32, #tpu.memory_space<vmem>>, vector<4x1xf32>
    tpu.vector_store %arg4[%c0_16, %c0_17], %18 {strides = array<i32>} : memref<4x1xf32, #tpu.memory_space<vmem>>, vector<4x1xf32>,
    %39 = arith.cmpi eq, %arg1, %arg0 : i32
    %cst_18 = arith.constant 1.000000e+30 : f32
    %40 = vector.broadcast %cst_18 : f32 to vector<4x1xf32>
    %41 = arith.select %39, %40, %14 : vector<4x1xf32>
    %42 = arith.index_cast %arg1 : i32 to index
    %c0_19 = arith.constant 0 : index
    %c0_20 = arith.constant 0 : index
    %43 = vector.load %arg6[%42, %c0_19, %c0_20] : memref<2x4x1xf32, #tpu.memory_space<vmem>>, vector<1x4x1xf32>
    %44 = vector.shape_cast %43 : vector<1x4x1xf32> to vector<4x1xf32>
    %45 = vector.shape_cast %41 : vector<4x1xf32> to vector<1x4x1xf32>
    tpu.vector_store %arg6[%42, %c0_19, %c0_20], %45 {strides = array<i32>} : memref<2x4x1xf32, #tpu.memory_space<vmem>>, vector<1x4x1xf32>,
    %c1_i32 = arith.constant 1 : i32
    %46 = arith.cmpi eq, %arg1, %c1_i32 : i32
    %47 = arith.extui %46 : i1 to i32
    %c0_i32_21 = arith.constant 0 : i32
    %48 = arith.cmpi ne, %47, %c0_i32_21 : i32
    scf.if %48 {
      %c0_22 = arith.constant 0 : index
      %c0_23 = arith.constant 0 : index
      %49 = vector.load %arg4[%c0_22, %c0_23] : memref<4x1xf32, #tpu.memory_space<vmem>>, vector<4x1xf32>
      %c0_24 = arith.constant 0 : index
      %c0_25 = arith.constant 0 : index
      %50 = vector.load %arg5[%c0_24, %c0_25] : memref<4x1xf32, #tpu.memory_space<vmem>>, vector<4x1xf32>
      %c0_26 = arith.constant 0 : index
      %c0_27 = arith.constant 0 : index
      %c0_28 = arith.constant 0 : index
      %51 = vector.load %arg6[%c0_26, %c0_27, %c0_28] : memref<2x4x1xf32, #tpu.memory_space<vmem>>, vector<2x4x1xf32>
      %52 = vector.shape_cast %49 : vector<4x1xf32> to vector<1x4x1xf32>
      %53 = vector.broadcast %52 : vector<1x4x1xf32> to vector<2x4x1xf32>
      %54 = arith.maximumf %53, %51 : vector<2x4x1xf32>
      %55 = arith.subf %51, %54 : vector<2x4x1xf32>
      %56 = math.exp %55 : vector<2x4x1xf32>
      %57 = vector.shape_cast %49 : vector<4x1xf32> to vector<1x4x1xf32>
      %58 = vector.broadcast %57 : vector<1x4x1xf32> to vector<2x4x1xf32>
      %59 = arith.subf %58, %54 : vector<2x4x1xf32>
      %60 = math.exp %59 : vector<2x4x1xf32>
      %61 = vector.shape_cast %50 : vector<4x1xf32> to vector<1x4x1xf32>
      %62 = vector.broadcast %61 : vector<1x4x1xf32> to vector<2x4x1xf32>
      %63 = arith.mulf %60, %62 : vector<2x4x1xf32>
      %64 = arith.addf %56, %63 : vector<2x4x1xf32>
      %65 = math.log %64 : vector<2x4x1xf32>
      %66 = arith.addf %54, %65 : vector<2x4x1xf32>
      %67 = arith.subf %66, %51 : vector<2x4x1xf32>
      %68 = vector.shape_cast %67 : vector<2x4x1xf32> to vector<1x2x4x1xf32>
      %cst_29 = arith.constant dense<0.000000e+00> : vector<1xf32>
      %69 = vector.multi_reduction <add>, %68, %cst_29 [1, 2, 3] : vector<1x2x4x1xf32> to vector<1xf32>
      %70 = vector.shape_cast %69 : vector<1xf32> to vector<1x1x1x1xf32>
      %71 = vector.extract %70[0, 0, 0, 0] : f32 from vector<1x1x1x1xf32>
      %cst_30 = arith.constant 2.500000e-01 : f32
      %72 = arith.mulf %71, %cst_30 : f32
      %73 = vector.broadcast %72 : f32 to vector<1x8x128xf32>
      %c0_31 = arith.constant 0 : index
      %c0_32 = arith.constant 0 : index
      %c0_33 = arith.constant 0 : index
      %74 = vector.load %arg3[%c0_31, %c0_32, %c0_33] : memref<1x8x128xf32, #tpu.memory_space<vmem>>, vector<1x8x128xf32>
      tpu.vector_store %arg3[%c0_31, %c0_32, %c0_33], %73 {strides = array<i32>} : memref<1x8x128xf32, #tpu.memory_space<vmem>>, vector<1x8x128xf32>,
    } else {
    }
    return
  }
  func.func @transform_0(%arg0: i32, %arg1: i32) -> (i32, i32, i32) {
    %c0_i32 = arith.constant 0 : i32
    %c0_i32_0 = arith.constant 0 : i32
    %c0_i32_1 = arith.constant 0 : i32
    %c0_i32_2 = arith.constant 0 : i32
    return %c0_i32, %c0_i32_0, %c0_i32_1 : i32, i32, i32
  }
  func.func @transform_1(%arg0: i32, %arg1: i32) -> (i32, i32, i32) {
    %c0_i32 = arith.constant 0 : i32
    %c0_i32_0 = arith.constant 0 : i32
    %c0_i32_1 = arith.constant 0 : i32
    return %arg0, %c0_i32, %c0_i32_0 : i32, i32, i32
  }
}

</mosaic_0001>

<bundles_post_ra>
// kernel: tpu_custom_call.1
= control target key start
LH: loop header
LB: loop body
LE: loop exit
PB: predicated region body
PF: predicated region fallthrough
CT: control target
= control target key end

     0   :  { %6 = vsyncpa [#allocation6], 0  ;;  %s768_s0 = inlined_call_operand.hbm [shape: bf16[2,4,32], index: 0, kind: input, shape index: {}]   ;;  %s769_s1 = inlined_call_operand.hbm [shape: f32[2,8,128], index: 1, kind: output, shape index: {}]  }
   0x1   :  { %7 = vsyncpa [#allocation7], 0 }
   0x2   :  { %9 = vsyncpa [#allocation7 + $0x1], 0  ;;  %s620_s6 = smov 0   ;;  %s622_s7 = smov 0  }
   0x3   :  { %s624_s8 = smov 0   ;;  %s626_s9 = smov 0  }
   0x4   :  { %s628_s10 = smov 0   ;;  %s630_s11 = smov 0  }
   0x5   :  { %s632_s12 = smov 0   ;;  %s634_s13 = smov 0  }
   0x6 LB: > { %s349_s14 = sadd.s32 4294967295, %s602_s13   ;;  %s350_s15 = sadd.s32 4294967294, %s602_s13   ;;  %s602_s13 = sphi %s634_s13, %s15_s13   ;;  %s598_s12 = sphi %s632_s12, %s779_s12   ;;  %s594_s11 = sphi %s630_s11, %s778_s11   ;;  %s590_s10 = sphi %s628_s10, %s777_s10   ;;  %s586_s9 = sphi %s626_s9, %s776_s9   ;;  %s582_s8 = sphi %s624_s8, %s775_s8   ;;  %s578_s7 = sphi %s622_s7, %s774_s7   ;;  %s574_s6 = sphi %s620_s6, %s773_s6  }
   0x7   : > { %s24_s16 = sadd.s32 1, %s594_s11  ;;  %s27_s17 = sadd.s32 1, %s598_s12 }
   0x8   : > { %p25_p0 = scmp.ge.s32.totalorder %s24_s16, 2  ;;  %s55_s18 = sadd.s32 1, %s582_s8 }
   0x9   : > { %p65_p1 = scmp.ne.s32.totalorder %s582_s8, %s578_s7  ;;  %p66_p2 = scmp.eq.s32.totalorder %s349_s14, 3 }
   0xa   : > { %s781_s16 = smov (%p25_p0, %s24_s16), 0  ;;  %s783_s17 = smov (!%p25_p0, %s27_s17), %s598_s12 }
   0xb   : > { %p670_p3 = por %p66_p2, %p65_p1  ;;  %p71_p4 = scmp.ne.s32.totalorder %s578_s7, %s574_s6 }
   0xc   : > { %p29_p5 = scmp.ge.s32.totalorder %s783_s17, 2  ;;  %p72_p6 = scmp.eq.s32.totalorder %s350_s15, 3 }
   0xd   : > { %p351_p7 = scmp.ge.s32.totalorder %s602_s13, 1  ;;  %p79_p8 = scmp.lt.s32.totalorder %s602_s13, 5 }
   0xe   : > { %s785_s17 = smov (%p29_p5, %s783_s17), 0  ;;  %p680_p9 = por %p72_p6, %p71_p4 }
   0xf   : > { %p684_p10 = pnand %p351_p7, %p79_p8  ;;  %s52_s22 = ssub.s32 %s598_s12, %s785_s17 }
  0x10   : > { %p53_p11 = scmp.eq.s32.totalorder %s52_s22, 0  ;;  %p382_p13 = scmp.eq.s32.totalorder %s349_s14, 0 }
  0x11   : > { %p374_p12 = pneg %p684_p10  ;;  %s90_s25 = sshll.u32 %s768_s0, 4  ;;  %s91_s25 = int_to_ptr.hbm [resolvable:$true] %s90_s25 }
  0x12   : > { %s696_s26 = scalar_select %p53_p11, %s582_s8, %s55_s18  }
  0x13   : > { %s604_s27 = smov [#allocation5]   ;;  %p375_p0 = pnand %p382_p13, %p374_p12 }
  0x14   : > { %s92_s28 = sshll.u32 %s604_s27, 4  ;;  %s605_s29 = smov 32   ;;  %s93_s28 = int_to_ptr.vmem [resolvable:$true] %s92_s28 }
  0x15   : > { %s606_s30 = smov 2   ;;  %108 = sbr.rel (%p684_p10) target bundleno = 785 (0x311), region = 24 }
  0x16   : > { %377 = dma.hbm_to_vmem [thread:$0]  (!%p375_p0), %s91_s25, 64, %s93_s28, [#allocation6], %s605_s29, %s605_s29, %s606_s30  }
  0x1a   : > { %565 = dma.done.wait (%p382_p13), [#allocation6], 64  }
  0x1b   : > { %567 = vsyncadd (%p382_p13), [#allocation6], 4294967232  ;;  %s121_s2 = sand.u32 1, %s578_s7   ;;  %p356_p1 = scmp.ne.s32.totalorder %s586_s9, 0 }
  0x1c   : > { %s703_s3 = sshll.u32 %s121_s2, 3 }
  0x1d   : > { %s123_s4 = scalar_lea.vmem [#allocation8], %s703_s3  ;;  %128 = sbr.rel (%p356_p1) target bundleno = 37 (0x25), region = 32 }
  0x22   : > { %vm129_vm0 = vcmask 3072   ;;  %v607_v0 = vmov -inf   ;;  %v608_v1 = vmov 0.0  }
  0x23   : > { %130 = vst.msk [vmem:[#allocation2] sm:$0xf] %vm129_vm0, %v607_v0 }
  0x24   : > { %131 = vst.msk [vmem:[#allocation3] sm:$0xf] %vm129_vm0, %v608_v1 }
  0x25 PF: > { %s358_s5 = sshll.u32 %s586_s9, 1  ;;  %vm138_vm1 = vcmask 261120   ;;  %s357_s15 = sshll.u32 %s590_s10, 1  ;;  %vm161_vm2 = vcmask 257024   ;;  %vm166_vm3 = vcmask 27648   ;;  %v609_v12 = vmov 0  }
  0x26   : > { %s136_s14 = scalar_lea.vmem [#allocation5], %s358_s5  ;;  %s133_s18 = scalar_lea.vmem [#allocation5], %s357_s15  ;;  %455 = vset.pattern.permute.xlu0 %v609_v12  ;;  %vm197_vm5 = vcmask 3072  }
  0x27   : > { %v137_v2 = vld [vmem:[%s136_s14] sm:$0x3]  ;;  %p200_p2 = scmp.eq.s32.totalorder %s586_s9, %s590_s10  ;;  %s360_s22 = sshll.u32 %s586_s9, 2 }
  0x28   : > { %v143_v3 = vsel %vm138_vm1, %v137_v2, 0  ;;  %v134_v4 = vld [vmem:[%s133_s18] sm:$0x3]  ;;  %v159_v5 = vunpack.c.l.bf16 %v137_v2  ;;  %s206_s23 = scalar_lea.vmem [#allocation4], %s360_s22  ;;  %p361_p4 = scmp.ne.s32.totalorder %s586_s9, 1 }
  0x29   : > { %152 = vmatpush.bf16.xpose.msra.mxu0 %v143_v3  ;;  %v158_v6 = vunpack.c.l.bf16 %v134_v4  ;;  %s201_s21 = scalar_select %p200_p2, 1, 0 }
  0x2a   : > { %v165_v16 = vld [vmem:[#allocation2] sm:$0xf] }
  0x2b   : > { %v160_v7 = vmul.f32 %v159_v5, %v158_v6  ;;  %v202_v13 = vstv %s201_s21  ;;  %v194_v34 = vld [vmem:[#allocation3] sm:$0xf] }
  0x2c   : > { %vm203_vm4 = vcmp.eq.s32.totalorder %v202_v13, 1 }
  0x2d   : > { %v162_v8 = vsel %vm161_vm2, %v160_v7, 0.0 }
  0x2e   : > { %163 = vadd.xlane.f32.xlu1 %v162_v8 }
  0x30   : > { %359 = vmatmul.msk.bf16.vlgmr.msra.gmra.mxu0 %vm138_vm1, %v134_v4 }
  0xa1   : > { %v164_v14 = vpop.xlane.xlu1 %163 }
  0xa2   : > { %v204_v15 = vsel %vm203_vm4, 1e+30, %v164_v14 }
  0xa3   : > { %207 = vst.msk [vmem:[%s206_s23] sm:$0xf] %vm197_vm5, %v204_v15 }
  0xad   : > { %v154_v9 = vpop.f32.mrf.mxu0 }
  0xae   : > { %v167_v10 = vsel %vm166_vm3, %v154_v9, -inf }
  0xaf   : > { %168 = vmax.xlane.f32.xlu0 %v167_v10 }
  0xb5   : > { %v156_v11 = vpop.f32.mrf.mxu0 }
 0x122   : > { %v169_v17 = vpop.xlane.xlu0 %168 }
 0x123   : > { %v170_v18 = vmax.f32 %v165_v16, %v169_v17 }
 0x125   : > { %v171_v19 = vsub.f32 %v165_v16, %v170_v18  ;;  %199 = vst.msk [vmem:[#allocation2] sm:$0xf] %vm197_vm5, %v170_v18  ;;  %176 = vperm.xlu0 %455, %v170_v18   ;;  %v189_v29 = vsub.f32 %v164_v14, %v170_v18 }
 0x127   : > { %v172_v30 = vmul.f32 1.442695, %v171_v19  ;;  %v190_v31 = vmul.f32 1.442695, %v189_v29 }
 0x197   : > { %v177_v20 = vpop.permute.xlu0 %176 }
 0x198   : > { %v179_v21 = vsub.f32 %v154_v9, %v177_v20 }
 0x19a   : > { %v180_v22 = vpack.c.bf16 %v179_v21, %v179_v21 }
 0x19c   : > { %v181_v23 = vunpack.c.l.bf16 %v180_v22 }
 0x19e   : > { %v182_v24 = vmul.f32 1.442695, %v181_v23 }
 0x1a0   : > { %456 = vpow2.f32 %v182_v24 }
 0x1a1   : > { %458 = vpow2.f32 %v172_v30 }
 0x1a2   : > { %460 = vpow2.f32 %v190_v31 }
 0x1a6   : > { %v457_v25 = vpop.eup %456 }
 0x1a7   : > { %v184_v26 = vpack.c.bf16 %v457_v25, %v457_v25  ;;  %v459_v32 = vpop.eup %458 }
 0x1a8   : > { %v461_v33 = vpop.eup %460  ;;  %v195_v38 = vmul.f32 %v459_v32, %v194_v34 }
 0x1a9   : > { %v185_v27 = vunpack.c.l.bf16 %v184_v26 }
 0x1ab   : > { %v186_v28 = vsel %vm166_vm3, %v185_v27, 0.0 }
 0x1ac   : > { %187 = vadd.xlane.f32.xlu1 %v186_v28 }
 0x21f   : > { %v188_v35 = vpop.xlane.xlu1 %187 }
 0x220   : > { %v192_v36 = vsub.f32 %v188_v35, %v461_v33 }
 0x222   : > { %v193_v37 = vmax.f32 %v192_v36, 0.0  ;;  %211 = sbr.rel (%p361_p4) target bundleno = 770 (0x302), region = 36 }
 0x224   : > { %v196_v39 = vadd.f32 %v195_v38, %v193_v37 }
 0x226   : > { %198 = vst.msk [vmem:[#allocation3] sm:$0xf] %vm197_vm5, %v196_v39 }
 0x227   : > { %v212_v40 = vld [vmem:[#allocation2] sm:$0xf]  ;;  %v214_v41 = vld [vmem:[#allocation4] sm:$0xf]  ;;  %v215_v42 = vld [vmem:[#allocation4 + $0x4] sm:$0xf] }
 0x228   : > { %v216_v43 = vmax.f32 %v212_v40, %v214_v41  ;;  %v217_v44 = vmax.f32 %v212_v40, %v215_v42 }
 0x22a   : > { %v218_v45 = vsub.f32 %v214_v41, %v216_v43  ;;  %v224_v46 = vsub.f32 %v212_v40, %v216_v43  ;;  %v219_v47 = vsub.f32 %v215_v42, %v217_v44  ;;  %v225_v48 = vsub.f32 %v212_v40, %v217_v44 }
 0x22c   : > { %v220_v49 = vmul.f32 1.442695, %v218_v45  ;;  %v226_v50 = vmul.f32 1.442695, %v224_v46  ;;  %v222_v51 = vmul.f32 1.442695, %v219_v47 }
 0x22d   : > { %v228_v52 = vmul.f32 1.442695, %v225_v48  ;;  %v213_v54 = vld [vmem:[#allocation3] sm:$0xf] }
 0x22e   : > { %462 = vpow2.f32 %v220_v49 }
 0x22f   : > { %464 = vpow2.f32 %v222_v51 }
 0x230   : > { %466 = vpow2.f32 %v226_v50 }
 0x231   : > { %468 = vpow2.f32 %v228_v52 }
 0x234   : > { %v463_v53 = vpop.eup %462 }
 0x235   : > { %v465_v55 = vpop.eup %464 }
 0x236   : > { %v467_v56 = vpop.eup %466 }
 0x237   : > { %v469_v57 = vpop.eup %468  ;;  %v230_v58 = vmul.f32 %v467_v56, %v213_v54 }
 0x238   : > { %v231_v59 = vmul.f32 %v469_v57, %v213_v54 }
 0x239   : > { %v232_v60 = vadd.f32 %v463_v53, %v230_v58 }
 0x23a   : > { %v233_v61 = vadd.f32 %v465_v55, %v231_v59 }
 0x23b   : > { %470 = vlog2.f32 %v232_v60 }
 0x23c   : > { %472 = vlog2.f32 %v233_v61 }
 0x241   : > { %v471_v62 = vpop.eup %470 }
 0x242   : > { %v473_v63 = vpop.eup %472  ;;  %v235_v0 = vmul.f32 0.6931472, %v471_v62 }
 0x243   : > { %v237_v1 = vmul.f32 0.6931472, %v473_v63 }
 0x244   : > { %v238_v2 = vadd.f32 %v235_v0, %v216_v43 }
 0x245   : > { %v239_v3 = vadd.f32 %v237_v1, %v217_v44 }
 0x246   : > { %v240_v4 = vsub.f32 %v238_v2, %v214_v41 }
 0x247   : > { %v241_v5 = vsub.f32 %v239_v3, %v215_v42 }
 0x248   : > { %v242_v6 = vsel %vm197_vm5, %v240_v4, 0.0 }
 0x249   : > { %v243_v7 = vsel %vm197_vm5, %v241_v5, 0.0 }
 0x24a   : > { %v244_v8 = vadd.f32 %v243_v7, %v242_v6 }
 0x24c   : > { %245 = vadd.xlane.f32.xlu0 %v244_v8 }
 0x2bf   : > { %v246_v9 = vpop.xlane.xlu0 %245 }
 0x2c0   : > { %v247_v10 = vrot.slane %v246_v9, 4 }
 0x2c2   : > { %v248_v11 = vadd.f32 %v247_v10, %v246_v9 }
 0x2c4   : > { %v249_v12 = vrot.slane %v248_v11, 2 }
 0x2c6   : > { %v250_v13 = vadd.f32 %v249_v12, %v248_v11 }
 0x2c8   : > { %v251_v14 = vrot.slane %v250_v13, 1 }
 0x2ca   : > { %v252_v15 = vadd.f32 %v251_v14, %v250_v13 }
 0x2cc   : > { %366 = vpush %v252_v15 }
 0x2fd   : > { %s367_s9 = spop %366 }
 0x2fe   : > { %s254_s24 = smul.f32 0.25, %s367_s9 }
 0x300   : > { %v255_v16 = vstv %s254_s24 }
 0x301   : > { %256 = vst [vmem:[%s123_s4] sm:$0xff] %v255_v16 }
 0x302 PF: > { %s363_s25 = sshll.u32 %s590_s10, 3  ;;  %s270_s30 = sshll.u32 %s123_s4, 4  ;;  %s271_s30 = int_to_ptr.vmem [resolvable:$true] %s270_s30 }
 0x303   : > { %s268_s29 = scalar_lea.hbm %s769_s1, %s363_s25  ;;  %s258_s14 = scalar_lea.sflag [#allocation7], %s121_s2 }
 0x304   : > { %s272_s5 = sshll.u32 %s268_s29, 4  ;;  %s524_s22 = scalar_lea.hbm %s769_s1, 16  ;;  %s273_s5 = int_to_ptr.hbm [resolvable:$true] %s272_s5 }
 0x305   : > { %s518_s15 = sshra.s32 %s273_s5, 4  ;;  %s519_s15 = int_to_ptr.hbm [resolvable:$true] %s518_s15 }
 0x306   : > { %s520_s18 = scalar_lea.hbm %s519_s15, 8  ;;  %p525_p8 = scmp.lt.s32.totalorder %s519_s15, %s769_s1 }
 0x307   : > { %p521_p5 = scmp.ne.s32.totalorder %s519_s15, %s520_s18  ;;  %p526_p10 = scmp.lt.s32.totalorder %s524_s22, %s520_s18 }
 0x309   : > { %p522_p6 = pnand %p521_p5, %p670_p3  ;;  %p527_p11 = por %p526_p10, %p525_p8 }
 0x30b   : > { %p523_p7 = pneg %p522_p6 }
 0x30d   : > { %p528_p12 = pnand %p527_p11, %p523_p7 }
 0x30f   : > { %531 = shalt.err (!%p528_p12)
}
 0x310   : > { %372 = dma.vmem_to_hbm [thread:$0]  (%p670_p3), %s271_s30, 128, %s273_s5, %s258_s14  }
 0x311 PF: > { %p384_p13 = scmp.ge.s32.totalorder %s602_s13, 2  ;;  %s284_s2 = sand.u32 1, %s574_s6  }
 0x312   : > { %s285_s3 = scalar_lea.sflag [#allocation7], %s284_s2 }
 0x313   : > { %p379_p0 = pnand %p384_p13, %p680_p9 }
 0x315   : > { %p380_p1 = pneg %p379_p0 }
 0x317   : > { %569 = dma.done.wait (%p380_p1), %s285_s3, 128  }
 0x318   : > { %571 = vsyncadd (%p380_p1), %s285_s3, 4294967168  ;;  %s15_s13 = sadd.s32 1, %s602_s13   ;;  %s773_s6 = smov %s578_s7 }
 0x319   : > { %p12_p2 = scmp.ge.s32.totalorder %s15_s13, 6   ;;  %s774_s7 = smov %s582_s8 }
 0x31a   : > { %s775_s8 = smov %s696_s26  ;;  %s776_s9 = smov %s594_s11 }
 0x31b   : > { %s777_s10 = smov %s598_s12  ;;  %s778_s11 = smov %s781_s16 }
 0x31c   : > { %s779_s12 = smov %s785_s17  ;;  %14 = sbr.rel (!%p12_p2) target bundleno = 6 (0x6), region = 72 }
 0x321   :  { %291 = vsyncpa [#allocation6], 1 }
 0x322   :  { %293 = vsyncpa [#allocation6 + $0x1], 1 }
 0x323   :  { %294 = vsyncpa [#allocation7], 1 }
 0x324   :  { %296 = vsyncpa [#allocation7 + $0x1], 1 }

</bundles_post_ra>
